<compile_context>
chip_gen: v7x
topology: tpu7x:2x2x1
jax: 0.10.0
libtpu: 0.0.40
codegen_flags: <defaults>
</compile_context>

<pallas_src>
import functools

import jax
import jax.numpy as jnp
from jax import lax
from jax.experimental import pallas as pl
from jax.experimental.pallas import tpu as pltpu

PAD = 2                      # halo needed by the widest tap (kernel_size=5)
N_SHIFTS = 5                 # shifted views of the stage-1 output (covers k=3 and k=5)
LANE = 128                   # lane granule used for L-tiling
MATMUL_DTYPE = jnp.bfloat16  # MXU operand dtype; accumulation stays f32


def _inception_kernel(x_ref, wf_ref, bf_ref, ws_ref, bo_ref, o_ref, *,
                      seq_len: int, tile_len: int):
    """One (batch, L-tile) grid step.  All data is in NCL layout.

    x_ref  : (1, 1, C_in, TL + 2*PAD)   bf16 halo'd activation window
    wf_ref : (C_ext, C_in)              bf16 fused stage-1 weight [I | w21 | w31]^T
    bf_ref : (C_ext, 1)                 f32  fused stage-1 bias   [0 | b21 | b31]
    ws_ref : (5, C_out_pad, C_ext)      bf16 block-structured per-shift weights
    bo_ref : (C_out_pad, 1)             f32  concatenated output biases
    o_ref  : (1, C_out_pad, TL)         f32  dense output block
    """
    TL = tile_len
    t = pl.program_id(1)

    x = x_ref[0, 0]                                     # (C_in, TLw) bf16
    TLw = x.shape[1]

    # Global sequence position of every window column.  Columns outside [0, L)
    # are conv zero padding: a 1x1 conv of a zero column would otherwise emit
    # its bias, so the stage-1 output is masked to exactly zero there.
    col = lax.broadcasted_iota(jnp.int32, (1, TLw), 1)
    gpos = t * TL + col - PAD
    valid = (gpos >= 0) & (gpos < seq_len)

    # ---- stage 1: fused 1x1 convs + raw-x passthrough, one matmul -----------
    z = jnp.dot(wf_ref[...], x, preferred_element_type=jnp.float32)   # (C_ext, TLw)
    y = jnp.where(valid, z + bf_ref[...], 0.0).astype(MATMUL_DTYPE)

    # ---- stage 2: five shifted matmuls, accumulated in f32 ------------------
    # shift s looks at output offset (s - PAD); W_s routes x rows / 1x1 rows to
    # branch_1 / branch_2 taps / branch_3 taps / branch_4 (pool folded as /3).
    acc = jnp.dot(ws_ref[0], y[:, 0:TL], preferred_element_type=jnp.float32)
    for s in range(1, N_SHIFTS):
        acc = acc + jnp.dot(ws_ref[s], y[:, s:s + TL],
                            preferred_element_type=jnp.float32)

    o_ref[0] = acc + bo_ref[...]                        # (C_out_pad, TL) dense store


def _round_up(x, m):
    return ((x + m - 1) // m) * m


def _fuse_params(params, c_in):
    """Build the fused stage-1 / stage-2 weights consumed by the kernel."""
    (w1, b1, w21, b21, w22, b22, w31, b31, w32, b32, w4, b4) = params
    C1, C21, C22 = w1.shape[-1], w21.shape[-1], w22.shape[-1]
    C31, C32, C4 = w31.shape[-1], w32.shape[-1], w4.shape[-1]
    c_total = C1 + C22 + C32 + C4
    c_out_pad = _round_up(c_total, 8)          # sublane-friendly output rows
    c_ext = c_in + C21 + C31

    # stage 1: [ I | w21 | w31 ]^T  -> (C_ext, C_in); identity rows pass x through.
    w_first = jnp.concatenate(
        [jnp.eye(c_in, dtype=jnp.float32), w21[0].T, w31[0].T], axis=0)
    b_first = jnp.concatenate(
        [jnp.zeros((c_in,), jnp.float32), b21[0], b31[0]], axis=0).reshape(c_ext, 1)

    # stage 2: per-shift block-structured weights (C_out_pad, C_ext).
    ws = jnp.zeros((N_SHIFTS, c_out_pad, c_ext), jnp.float32)
    r2, r3, r4 = C1, C1 + C22, C1 + C22 + C32
    # branch 1: 1x1 on the center (shift s = PAD) x rows.
    ws = ws.at[PAD, 0:C1, 0:c_in].set(w1[0].T)
    for s in (1, 2, 3):
        # branch 4: AvgPool(k=3,pad=1,count_include_pad) folded as w4/3 on x rows.
        ws = ws.at[s, r4:c_total, 0:c_in].set(w4[0].T / 3.0)
        # branch 2: k=3 tap (offset s-2 = k-1 -> k = s-1) on the branch_2_1 rows.
        ws = ws.at[s, r2:r3, c_in:c_in + C21].set(w22[s - 1].T)
    for s in range(N_SHIFTS):
        # branch 3: k=5 tap (offset s-2 = k-2 -> k = s) on the branch_3_1 rows.
        ws = ws.at[s, r3:r4, c_in + C21:c_ext].set(w32[s].T)

    b_out = jnp.zeros((c_out_pad, 1), jnp.float32)
    b_out = b_out.at[:c_total, 0].set(
        jnp.concatenate([b1[0], b22[0], b32[0], b4[0]], axis=0))

    return (w_first.astype(MATMUL_DTYPE), b_first,
            ws.astype(MATMUL_DTYPE), b_out, c_total, c_out_pad)


def inception_forward(x_ncl, params, *, tile_len=512):
    """x_ncl: (B, C_in, L) float32 (PyTorch NCL). Returns (B, C_out, L) float32."""
    B, C_in, L = x_ncl.shape
    w_first, b_first, ws, b_out, c_total, c_out_pad = _fuse_params(params, C_in)

    if L <= tile_len:
        TL, NT = L, 1                                   # single tile, no L padding
    else:
        TL = max(LANE, (tile_len // LANE) * LANE)       # lane-aligned tiles
        NT = -(-L // TL)
    L_tiled = NT * TL
    TLw = TL + 2 * PAD

    # bf16 activations (half the DMA bytes); zero-pad by the halo + L tail, then
    # build overlapping halo windows (B, NT, C_in, TLw) — plain JAX glue, the
    # duplication is only 2*PAD columns per tile.
    x_bf = x_ncl.astype(MATMUL_DTYPE)
    x_pad = jnp.pad(x_bf, ((0, 0), (0, 0), (PAD, PAD + (L_tiled - L))))
    x_win = jnp.stack(
        [x_pad[:, :, t * TL: t * TL + TLw] for t in range(NT)], axis=1)

    kernel = functools.partial(_inception_kernel, seq_len=L, tile_len=TL)

    out = pl.pallas_call(
        kernel,
        out_shape=jax.ShapeDtypeStruct((B, c_out_pad, L_tiled), jnp.float32),
        grid=(B, NT),
        in_specs=[
            pl.BlockSpec((1, 1, C_in, TLw), lambda b, t: (b, t, 0, 0)),
            pl.BlockSpec(w_first.shape, lambda b, t: (0, 0)),
            pl.BlockSpec(b_first.shape, lambda b, t: (0, 0)),
            pl.BlockSpec(ws.shape, lambda b, t: (0, 0, 0)),
            pl.BlockSpec(b_out.shape, lambda b, t: (0, 0)),
        ],
        out_specs=pl.BlockSpec((1, c_out_pad, TL), lambda b, t: (b, 0, t)),
        compiler_params=pltpu.CompilerParams(
            dimension_semantics=("parallel", "parallel"),   # both TCs busy on v7x
            vmem_limit_bytes=32 * 1024 * 1024,              # safe on v5e/v6e/v7x
        ),
    )(x_win, w_first, b_first, ws, b_out)

    # Strip channel / length padding; layout is already NCL — no transpose.
    return out[:, :c_total, :L]


# ------------------------- parameter construction ---------------------------
def make_params(key, input_channels, fm):
    """Deterministic synthetic weights.  Conv1d weights stored as (K, C_in, C_out)
    (transpose of torch's (C_out, C_in, K)); biases as (1, C_out)."""
    def conv(key, c_in, c_out, k):
        kw, kb = jax.random.split(key)
        bound = 1.0 / jnp.sqrt(c_in * k)
        w = jax.random.uniform(kw, (k, c_in, c_out), jnp.float32, -bound, bound)
        b = jax.random.uniform(kb, (1, c_out), jnp.float32, -bound, bound)
        return w, b

    keys = jax.random.split(key, 6)
    w1, b1 = conv(keys[0], input_channels, fm["branch_1"], 1)
    w21, b21 = conv(keys[1], input_channels, fm["branch_2_1"], 1)
    w22, b22 = conv(keys[2], fm["branch_2_1"], fm["branch_2_2"], 3)
    w31, b31 = conv(keys[3], input_channels, fm["branch_3_1"], 1)
    w32, b32 = conv(keys[4], fm["branch_3_1"], fm["branch_3_2"], 5)
    w4, b4 = conv(keys[5], input_channels, fm["branch_4"], 1)
    return (w1, b1, w21, b21, w22, b22, w31, b31, w32, b32, w4, b4)


# ------------------------- pure-JAX f32 reference ----------------------------
def _conv1d_ref(x_ncl, w_kio, b, pad):
    w_oiw = jnp.transpose(w_kio, (2, 1, 0))          # (C_out, C_in, K)
    y = lax.conv_general_dilated(
        x_ncl, w_oiw, window_strides=(1,), padding=[(pad, pad)],
        dimension_numbers=("NCW", "OIW", "NCW"))
    return y + b[0][None, :, None]


def inception_ref(x_ncl, params):
    (w1, b1, w21, b21, w22, b22, w31, b31, w32, b32, w4, b4) = params
    y1 = _conv1d_ref(x_ncl, w1, b1, 0)
    y2 = _conv1d_ref(_conv1d_ref(x_ncl, w21, b21, 0), w22, b22, 1)
    y3 = _conv1d_ref(_conv1d_ref(x_ncl, w31, b31, 0), w32, b32, 2)
    L = x_ncl.shape[-1]
    xp = jnp.pad(x_ncl, ((0, 0), (0, 0), (1, 1)))
    pooled = (xp[:, :, 0:L] + xp[:, :, 1:L + 1] + xp[:, :, 2:L + 2]) / 3.0
    y4 = _conv1d_ref(pooled, w4, b4, 0)
    return jnp.concatenate([y1, y2, y3, y4], axis=1)


if __name__ == "__main__":
    B, C_in, L = 2, 4, 16
    fm = {"branch_1": 8, "branch_2_1": 4, "branch_2_2": 8,
          "branch_3_1": 4, "branch_3_2": 8, "branch_4": 8}

    key = jax.random.PRNGKey(0)
    kx, kp = jax.random.split(key)
    x = jax.random.normal(kx, (B, C_in, L), jnp.float32)
    params = make_params(kp, C_in, fm)

    out = jax.jit(inception_forward)(x, params)
    out = jax.block_until_ready(out)

    ref = inception_ref(x, params)
    c_total = sum(fm[k] for k in ("branch_1", "branch_2_2", "branch_3_2", "branch_4"))
    assert out.shape == (B, c_total, L)
    # bf16 MXU operands (f32 accumulation) -> loosened tolerance vs the f32 reference.
    assert jnp.allclose(out, ref, atol=5e-2, rtol=5e-2), "mismatch vs reference"

    print("KERNEL_OK")
</pallas_src>

<mosaic_0001>
module attributes {stable_mosaic.version = 11 : i64} {
  func.func @_inception_kernel(%arg0: i32, %arg1: i32, %arg2: memref<1x1x4x20xbf16, #tpu.memory_space<vmem>>, %arg3: memref<12x4xbf16, #tpu.memory_space<vmem>>, %arg4: memref<12x1xf32, #tpu.memory_space<vmem>>, %arg5: memref<5x32x12xbf16, #tpu.memory_space<vmem>>, %arg6: memref<32x1xf32, #tpu.memory_space<vmem>>, %arg7: memref<1x32x16xf32, #tpu.memory_space<vmem>>) attributes {dimension_semantics = [#tpu.dimension_semantics<parallel>, #tpu.dimension_semantics<parallel>], iteration_bounds = array<i64: 2, 1>, scalar_prefetch = 0 : i64, scratch_operands = 0 : i64, tpu.core_type = #tpu.core_type<tc>, window_params = [{transform_indices = @transform_0, window_bounds = array<i64: 1, 1, 4, 20>}, {pipeline_mode = #tpu.pipeline_mode<synchronous>, transform_indices = @transform_1, window_bounds = array<i64: 12, 4>}, {pipeline_mode = #tpu.pipeline_mode<synchronous>, transform_indices = @transform_2, window_bounds = array<i64: 12, 1>}, {pipeline_mode = #tpu.pipeline_mode<synchronous>, transform_indices = @transform_3, window_bounds = array<i64: 5, 32, 12>}, {pipeline_mode = #tpu.pipeline_mode<synchronous>, transform_indices = @transform_4, window_bounds = array<i64: 32, 1>}, {transform_indices = @transform_5, window_bounds = array<i64: 1, 32, 16>}]} {
    %c0 = arith.constant 0 : index
    %c0_0 = arith.constant 0 : index
    %c0_1 = arith.constant 0 : index
    %c0_2 = arith.constant 0 : index
    %0 = vector.load %arg2[%c0, %c0_0, %c0_1, %c0_2] : memref<1x1x4x20xbf16, #tpu.memory_space<vmem>>, vector<1x1x4x20xbf16>
    %1 = vector.shape_cast %0 : vector<1x1x4x20xbf16> to vector<4x20xbf16>
    %2 = tpu.iota {dimensions = array<i32: 1>} : vector<1x20xi32>
    %c16_i32 = arith.constant 16 : i32
    %3 = arith.muli %arg1, %c16_i32 : i32
    %4 = vector.broadcast %3 : i32 to vector<1x20xi32>
    %5 = arith.addi %4, %2 : vector<1x20xi32>
    %c2_i32 = arith.constant 2 : i32
    %6 = vector.broadcast %c2_i32 : i32 to vector<1x20xi32>
    %7 = arith.subi %5, %6 : vector<1x20xi32>
    %c0_i32 = arith.constant 0 : i32
    %8 = vector.broadcast %c0_i32 : i32 to vector<1x20xi32>
    %9 = arith.cmpi sge, %7, %8 : vector<1x20xi32>
    %c16_i32_3 = arith.constant 16 : i32
    %10 = vector.broadcast %c16_i32_3 : i32 to vector<1x20xi32>
    %11 = arith.cmpi slt, %7, %10 : vector<1x20xi32>
    %12 = arith.andi %9, %11 : vector<1x20xi1>
    %c0_4 = arith.constant 0 : index
    %c0_5 = arith.constant 0 : index
    %13 = vector.load %arg3[%c0_4, %c0_5] : memref<12x4xbf16, #tpu.memory_space<vmem>>, vector<12x4xbf16>
    %cst = arith.constant dense<0.000000e+00> : vector<12x20xf32>
    %14 = tpu.matmul %13, %1, %cst {dimension_numbers = #tpu.dot_dimension_numbers<[1], [0], [0], [1], [0, 0, 1, 1], [], []>} : vector<12x4xbf16>, vector<4x20xbf16>, vector<12x20xf32> -> vector<12x20xf32>
    %c0_6 = arith.constant 0 : index
    %c0_7 = arith.constant 0 : index
    %15 = vector.load %arg4[%c0_6, %c0_7] : memref<12x1xf32, #tpu.memory_space<vmem>>, vector<12x1xf32>
    %16 = vector.broadcast %15 : vector<12x1xf32> to vector<12x20xf32>
    %17 = arith.addf %14, %16 : vector<12x20xf32>
    %cst_8 = arith.constant 0.000000e+00 : f32
    %18 = vector.shape_cast %12 : vector<1x20xi1> to vector<1x20xi1>
    %19 = vector.broadcast %18 : vector<1x20xi1> to vector<12x20xi1>
    %20 = vector.broadcast %cst_8 : f32 to vector<12x20xf32>
    %21 = arith.select %19, %17, %20 : vector<12x20xi1>, vector<12x20xf32>
    %22 = arith.truncf %21 : vector<12x20xf32> to vector<12x20xbf16>
    %c0_9 = arith.constant 0 : index
    %c0_10 = arith.constant 0 : index
    %c0_11 = arith.constant 0 : index
    %23 = vector.load %arg5[%c0_9, %c0_10, %c0_11] : memref<5x32x12xbf16, #tpu.memory_space<vmem>>, vector<1x32x12xbf16>
    %24 = vector.shape_cast %23 : vector<1x32x12xbf16> to vector<32x12xbf16>
    %25 = vector.extract_strided_slice %22 {offsets = [0, 0], sizes = [12, 16], strides = [1, 1]} : vector<12x20xbf16> to vector<12x16xbf16>
    %cst_12 = arith.constant dense<0.000000e+00> : vector<32x16xf32>
    %26 = tpu.matmul %24, %25, %cst_12 {dimension_numbers = #tpu.dot_dimension_numbers<[1], [0], [0], [1], [0, 0, 1, 1], [], []>} : vector<32x12xbf16>, vector<12x16xbf16>, vector<32x16xf32> -> vector<32x16xf32>
    %c1 = arith.constant 1 : index
    %c0_13 = arith.constant 0 : index
    %c0_14 = arith.constant 0 : index
    %27 = vector.load %arg5[%c1, %c0_13, %c0_14] : memref<5x32x12xbf16, #tpu.memory_space<vmem>>, vector<1x32x12xbf16>
    %28 = vector.shape_cast %27 : vector<1x32x12xbf16> to vector<32x12xbf16>
    %29 = vector.extract_strided_slice %22 {offsets = [0, 1], sizes = [12, 16], strides = [1, 1]} : vector<12x20xbf16> to vector<12x16xbf16>
    %cst_15 = arith.constant dense<0.000000e+00> : vector<32x16xf32>
    %30 = tpu.matmul %28, %29, %cst_15 {dimension_numbers = #tpu.dot_dimension_numbers<[1], [0], [0], [1], [0, 0, 1, 1], [], []>} : vector<32x12xbf16>, vector<12x16xbf16>, vector<32x16xf32> -> vector<32x16xf32>
    %31 = arith.addf %26, %30 : vector<32x16xf32>
    %c2 = arith.constant 2 : index
    %c0_16 = arith.constant 0 : index
    %c0_17 = arith.constant 0 : index
    %32 = vector.load %arg5[%c2, %c0_16, %c0_17] : memref<5x32x12xbf16, #tpu.memory_space<vmem>>, vector<1x32x12xbf16>
    %33 = vector.shape_cast %32 : vector<1x32x12xbf16> to vector<32x12xbf16>
    %34 = vector.extract_strided_slice %22 {offsets = [0, 2], sizes = [12, 16], strides = [1, 1]} : vector<12x20xbf16> to vector<12x16xbf16>
    %cst_18 = arith.constant dense<0.000000e+00> : vector<32x16xf32>
    %35 = tpu.matmul %33, %34, %cst_18 {dimension_numbers = #tpu.dot_dimension_numbers<[1], [0], [0], [1], [0, 0, 1, 1], [], []>} : vector<32x12xbf16>, vector<12x16xbf16>, vector<32x16xf32> -> vector<32x16xf32>
    %36 = arith.addf %31, %35 : vector<32x16xf32>
    %c3 = arith.constant 3 : index
    %c0_19 = arith.constant 0 : index
    %c0_20 = arith.constant 0 : index
    %37 = vector.load %arg5[%c3, %c0_19, %c0_20] : memref<5x32x12xbf16, #tpu.memory_space<vmem>>, vector<1x32x12xbf16>
    %38 = vector.shape_cast %37 : vector<1x32x12xbf16> to vector<32x12xbf16>
    %39 = vector.extract_strided_slice %22 {offsets = [0, 3], sizes = [12, 16], strides = [1, 1]} : vector<12x20xbf16> to vector<12x16xbf16>
    %cst_21 = arith.constant dense<0.000000e+00> : vector<32x16xf32>
    %40 = tpu.matmul %38, %39, %cst_21 {dimension_numbers = #tpu.dot_dimension_numbers<[1], [0], [0], [1], [0, 0, 1, 1], [], []>} : vector<32x12xbf16>, vector<12x16xbf16>, vector<32x16xf32> -> vector<32x16xf32>
    %41 = arith.addf %36, %40 : vector<32x16xf32>
    %c4 = arith.constant 4 : index
    %c0_22 = arith.constant 0 : index
    %c0_23 = arith.constant 0 : index
    %42 = vector.load %arg5[%c4, %c0_22, %c0_23] : memref<5x32x12xbf16, #tpu.memory_space<vmem>>, vector<1x32x12xbf16>
    %43 = vector.shape_cast %42 : vector<1x32x12xbf16> to vector<32x12xbf16>
    %44 = vector.extract_strided_slice %22 {offsets = [0, 4], sizes = [12, 16], strides = [1, 1]} : vector<12x20xbf16> to vector<12x16xbf16>
    %cst_24 = arith.constant dense<0.000000e+00> : vector<32x16xf32>
    %45 = tpu.matmul %43, %44, %cst_24 {dimension_numbers = #tpu.dot_dimension_numbers<[1], [0], [0], [1], [0, 0, 1, 1], [], []>} : vector<32x12xbf16>, vector<12x16xbf16>, vector<32x16xf32> -> vector<32x16xf32>
    %46 = arith.addf %41, %45 : vector<32x16xf32>
    %c0_25 = arith.constant 0 : index
    %c0_26 = arith.constant 0 : index
    %47 = vector.load %arg6[%c0_25, %c0_26] : memref<32x1xf32, #tpu.memory_space<vmem>>, vector<32x1xf32>
    %48 = vector.broadcast %47 : vector<32x1xf32> to vector<32x16xf32>
    %49 = arith.addf %46, %48 : vector<32x16xf32>
    %c0_27 = arith.constant 0 : index
    %c0_28 = arith.constant 0 : index
    %c0_29 = arith.constant 0 : index
    %50 = vector.load %arg7[%c0_27, %c0_28, %c0_29] : memref<1x32x16xf32, #tpu.memory_space<vmem>>, vector<1x32x16xf32>
    %51 = vector.shape_cast %50 : vector<1x32x16xf32> to vector<32x16xf32>
    %52 = vector.shape_cast %49 : vector<32x16xf32> to vector<1x32x16xf32>
    tpu.vector_store %arg7[%c0_27, %c0_28, %c0_29], %52 {strides = array<i32>} : memref<1x32x16xf32, #tpu.memory_space<vmem>>, vector<1x32x16xf32>,
    return
  }
  func.func @transform_0(%arg0: i32, %arg1: i32) -> (i32, i32, i32, i32) {
    %c0_i32 = arith.constant 0 : i32
    %c0_i32_0 = arith.constant 0 : i32
    %c0_i32_1 = arith.constant 0 : i32
    return %arg0, %arg1, %c0_i32, %c0_i32_0 : i32, i32, i32, i32
  }
  func.func @transform_1(%arg0: i32, %arg1: i32) -> (i32, i32) {
    %c0_i32 = arith.constant 0 : i32
    %c0_i32_0 = arith.constant 0 : i32
    %c0_i32_1 = arith.constant 0 : i32
    return %c0_i32, %c0_i32_0 : i32, i32
  }
  func.func @transform_2(%arg0: i32, %arg1: i32) -> (i32, i32) {
    %c0_i32 = arith.constant 0 : i32
    %c0_i32_0 = arith.constant 0 : i32
    %c0_i32_1 = arith.constant 0 : i32
    return %c0_i32, %c0_i32_0 : i32, i32
  }
  func.func @transform_3(%arg0: i32, %arg1: i32) -> (i32, i32, i32) {
    %c0_i32 = arith.constant 0 : i32
    %c0_i32_0 = arith.constant 0 : i32
    %c0_i32_1 = arith.constant 0 : i32
    %c0_i32_2 = arith.constant 0 : i32
    return %c0_i32, %c0_i32_0, %c0_i32_1 : i32, i32, i32
  }
  func.func @transform_4(%arg0: i32, %arg1: i32) -> (i32, i32) {
    %c0_i32 = arith.constant 0 : i32
    %c0_i32_0 = arith.constant 0 : i32
    %c0_i32_1 = arith.constant 0 : i32
    return %c0_i32, %c0_i32_0 : i32, i32
  }
  func.func @transform_5(%arg0: i32, %arg1: i32) -> (i32, i32, i32) {
    %c0_i32 = arith.constant 0 : i32
    %c0_i32_0 = arith.constant 0 : i32
    return %arg0, %c0_i32, %arg1 : i32, i32, i32
  }
}

</mosaic_0001>

<bundles_post_ra>
// kernel: inception_forward.1
= control target key start
LH: loop header
LB: loop body
LE: loop exit
PB: predicated region body
PF: predicated region fallthrough
CT: control target
= control target key end

     0   :  { %s1066_s18 = smov 0   ;;  %s1068_s19 = smov 0   ;;  %s1174_s0 = inlined_call_operand.vmem [shape: bf16[2,1,4,20], index: 0, kind: input, shape index: {}]   ;;  %s1175_s1 = inlined_call_operand.vmem [shape: bf16[12,4], index: 1, kind: input, shape index: {}]   ;;  %s1176_s2 = inlined_call_operand.vmem [shape: f32[12,1], index: 2, kind: input, shape index: {}]   ;;  %s1177_s3 = inlined_call_operand.vmem [shape: bf16[5,32,12], index: 3, kind: input, shape index: {}]   ;;  %s1178_s4 = inlined_call_operand.vmem [shape: f32[32,1], index: 4, kind: input, shape index: {}]   ;;  %s1179_s5 = inlined_call_operand.vmem [shape: f32[2,32,16], index: 5, kind: output, shape index: {}]  }
   0x1   :  { %s1070_s20 = smov 0  }
   0x2 LB: > { %s27_s21 = sadd.s32 1, %s1023_s19  ;;  %p841_p0 = scmp.ge.s32.totalorder %s1027_s20, 1  ;;  %s1027_s20 = sphi %s1070_s20, %s15_s20   ;;  %s1023_s19 = sphi %s1068_s19, %s1181_s19   ;;  %s1019_s18 = sphi %s1066_s18, %s1180_s18  }
   0x3   : > { %p29_p1 = scmp.ge.s32.totalorder %s27_s21, 2  ;;  %p205_p2 = scmp.lt.s32.totalorder %s1027_s20, 3 }
   0x5   : > { %s1183_s21 = smov (%p29_p1, %s27_s21), 0  ;;  %p206_p3 = pnand %p841_p0, %p205_p2 }
   0x6   : > { %p238_p4 = scmp.lt.s32.totalorder (!%p206_p3), %s1019_s18, 1  ;;  %v1029_v0 = vmov (!%p206_p3), 0.0   ;;  %vm1030_vm0 = vmmov (!%p206_p3), 0   ;;  %v1031_v1 = vmov (!%p206_p3), 0   ;;  %v266_v2 = vld [vmem:[%s1176_s2] sm:$0xff] (!%p206_p3)  ;;  %vm287_vm1 = vcmask (!%p206_p3), 1041408  }
   0x7   : > { %209 = sbr.rel (%p206_p3) target bundleno = 604 (0x25c), region = 40  ;;  %904 = vmatprep.subr.bf16.mxu0 (!%p206_p3), %v1029_v0  ;;  %906 = vmatprep.mubr.msk.bf16.mxu0 (!%p206_p3), %vm1030_vm0, %v1029_v0  ;;  %v267_v3 = vld [vmem:[%s1176_s2 + $0x8] sm:$0xf] (!%p206_p3)  ;;  %v994_v4 = vld [vmem:[%s1175_s1] sm:$0x3f] (!%p206_p3)   ;;  %vm283_vm2 = vcmask (!%p206_p3), 31744   ;;  %v255_v7 = vlaneseq (!%p206_p3) }
   0x8   : > { %992 = vset.pattern.permute.xlu0 (!%p206_p3), %v1031_v1  ;;  %993 = vset.pattern.permute.xlu1 (!%p206_p3), %v1031_v1  ;;  %v995_v11 = vld [vmem:[%s1177_s3 + $0x20] sm:$0xff] (!%p206_p3)   ;;  %vm359_vm3 = vcmask (!%p206_p3), 97280   ;;  %v997_v13 = vld [vmem:[%s1177_s3 + $0x10] sm:$0xff] (!%p206_p3)   ;;  %s1032_s11 = smov (!%p206_p3), 125   ;;  %s1033_s12 = smov (!%p206_p3), 126   ;;  %v725_v25 = vld [vmem:[%s1178_s4 + $0x8] sm:$0xff] (!%p206_p3) }
   0x9   : > { %270 = vperm.xlu0 (!%p206_p3), %992, %v266_v2   ;;  %v256_v8 = vand.u32 (!%p206_p3), 127, %v255_v7  ;;  %924 = vmatprep.mubr.msk.bf16.mxu1 (!%p206_p3), %vm359_vm3, %v995_v11  ;;  %v724_v23 = vld [vmem:[%s1178_s4] sm:$0xff] (!%p206_p3)  ;;  %s1034_s15 = smov (!%p206_p3), 127   ;;  %v726_v24 = vld [vmem:[%s1178_s4 + $0x10] sm:$0xff] (!%p206_p3)  ;;  %s1035_s22 = smov (!%p206_p3), 124   ;;  %v727_v26 = vld [vmem:[%s1178_s4 + $0x18] sm:$0xff] (!%p206_p3) }
   0xa   : > { %vm366_vm7 = vcmask (!%p206_p3), 1045504   ;;  %v996_v29 = vld [vmem:[%s1177_s3 + $0x28] sm:$0xff] (!%p206_p3)   ;;  %v999_v31 = vld [vmem:[%s1177_s3 + $0x30] sm:$0xff] (!%p206_p3)   ;;  %v998_v35 = vld [vmem:[%s1177_s3 + $0x18] sm:$0xff] (!%p206_p3)   ;;  %vm752_vm8 = vcmask (!%p206_p3), 130048  }
   0xb   : > { %v845_v9 = vadd.s32 (!%p206_p3), 4294967294, %v256_v8  ;;  %v1001_v36 = vld [vmem:[%s1177_s3] sm:$0xff] (!%p206_p3)   ;;  %v1000_v39 = vld [vmem:[%s1177_s3 + $0x38] sm:$0xff] (!%p206_p3)   ;;  %v1002_v42 = vld [vmem:[%s1177_s3 + $0x8] sm:$0xff] (!%p206_p3)  }
   0xc   : > { %v1003_v40 = vld [vmem:[%s1177_s3 + $0x40] sm:$0xff] (!%p206_p3)   ;;  %v1004_v43 = vld [vmem:[%s1177_s3 + $0x48] sm:$0xff] (!%p206_p3)  }
   0xd   : > { %275 = vperm.xlu0 (!%p206_p3), %992, %v267_v3   ;;  %vm261_vm4 = vcmp.ge.s32.totalorder (!%p206_p3), %v845_v9, 0  ;;  %vm262_vm5 = vcmp.lt.s32.totalorder (!%p206_p3), %v845_v9, 16 }
   0xe   : > { %s1185_s18 = smov (!%p238_p4, %s1019_s18), 1  ;;  %vm263_vm6 = vmand %vm261_vm4, %vm262_vm5 }
   0xf   : > { %s842_s26 = sshll.u32 %s1185_s18, 1 }
  0x10   : > { %s244_s29 = scalar_lea.vmem %s1174_s0, %s842_s26 }
  0x11   : > { %v254_v5 = vld [vmem:[%s244_s29] sm:$0x3] }
  0x12   : > { %v289_v6 = vsel %vm287_vm1, %v254_v5, 0 }
  0x13   : > { %905 = vmatpush3.bf16.msra.mxu0 %v289_v6 }
  0x16   : > { %907 = vmatmul.mubr.msk.bf16.vlgmr.msra.gmra.mrb[0].mxu0 %vm283_vm2, %v994_v4 }
  0x17   : > { %912 = vmatprep.mubr.msk.bf16.mxu0 %vm359_vm3, %v997_v13 }
  0x88   : > { %v271_v10 = vpop.permute.xlu0 %270 }
  0x8c   : > { %v276_v16 = vpop.permute.xlu0 %275 }
  0xe9   : > { %v325_v12 = vpop.f32.mrb[0].mxu0 }
  0xea   : > { %v326_v14 = vadd.f32 %v325_v12, %v271_v10  ;;  %v908_v15 = vpop.f32.mrb[1].mxu0 }
  0xeb   : > { %v328_v17 = vpop.f32.mrb[2].mxu0 }
  0xec   : > { %v329_v18 = vadd.f32 %v328_v17, %v276_v16  ;;  %v909_v19 = vpop.f32.mrb[3].mxu0  ;;  %v334_v20 = vsel %vm263_vm6, %v326_v14, 0.0 }
  0xee   : > { %v335_v21 = vsel %vm263_vm6, %v329_v18, 0.0 }
  0xef   : > { %v336_v22 = vpack.c.bf16 %v335_v21, %v334_v20 }
  0xf1   : > { %581 = vrot.lane.b32.xlu0 %v336_v22, %s1032_s11  ;;  %502 = vrot.lane.b32.xlu1 %v336_v22, %s1033_s12  ;;  %v436_v38 = vsel %vm366_vm7, %v336_v22, 0 }
  0xf5   : > { %730 = vperm.xlu0 %992, %v724_v23   ;;  %357 = vrot.lane.b32.xlu1 %v336_v22, %s1034_s15 }
  0xf9   : > { %740 = vperm.xlu0 %992, %v726_v24   ;;  %660 = vrot.lane.b32.xlu1 %v336_v22, %s1035_s22  ;;  %s886_s22 = sshll.u32 %s1185_s18, 5 }
  0xfa   : > { %s252_s25 = scalar_lea.vmem %s1179_s5, %s886_s22 }
  0xfd   : > { %735 = vperm.xlu1 %993, %v725_v25  }
 0x101   : > { %745 = vperm.xlu1 %993, %v727_v26  }
 0x163   : > { %v503_v27 = vpop.permute.xlu1 %502  ;;  %v582_v30 = vpop.permute.xlu0 %581 }
 0x164   : > { %958 = vmatprep.subr.msk.bf16.mxu1 %vm366_vm7, %v503_v27  ;;  %v511_v28 = vsel %vm366_vm7, %v503_v27, 0  ;;  %v590_v33 = vsel %vm366_vm7, %v582_v30, 0 }
 0x165   : > { %923 = vmatpush3.bf16.msra.mxu1 %v511_v28 }
 0x166   : > { %959 = vmatprep.subr.msk.bf16.mxu1 %vm366_vm7, %v582_v30 }
 0x167   : > { %v358_v32 = vpop.permute.xlu1 %357 }
 0x168   : > { %v368_v34 = vsel %vm366_vm7, %v358_v32, 0  ;;  %956 = vmatprep.subr.msk.bf16.mxu0 %vm366_vm7, %v358_v32  ;;  %925 = vmatmul.mubr.msk.bf16.vlgmr.msra.gmra.mrb[0].mxu1 %vm359_vm3, %v996_v29 }
 0x169   : > { %911 = vmatpush3.bf16.msra.mxu0 %v368_v34  ;;  %929 = vmatpush3.bf16.msra.mxu1 %v590_v33 }
 0x16a   : > { %957 = vmatprep.subr.msk.bf16.mxu0 %vm366_vm7, %v336_v22  ;;  %930 = vmatprep.mubr.msk.bf16.mxu1 %vm359_vm3, %v999_v31 }
 0x16b   : > { %v661_v37 = vpop.permute.xlu1 %660 }
 0x16c   : > { %913 = vmatmul.mubr.msk.bf16.vlgmr.msra.gmra.mrb[4].mxu0 %vm359_vm3, %v998_v35  ;;  %960 = vmatprep.subr.msk.bf16.mxu1 %vm366_vm7, %v661_v37  ;;  %v669_v41 = vsel %vm366_vm7, %v661_v37, 0 }
 0x16d   : > { %917 = vmatpush3.bf16.msra.mxu0 %v436_v38  ;;  %918 = vmatprep.mubr.msk.bf16.mxu0 %vm359_vm3, %v1001_v36 }
 0x174   : > { %931 = vmatmul.mubr.msk.bf16.vlgmr.msra.gmra.mrb[0].mxu1 %vm359_vm3, %v1000_v39  ;;  %v731_v48 = vpop.permute.xlu0 %730 }
 0x175   : > { %935 = vmatpush3.bf16.msra.mxu1 %v669_v41  ;;  %936 = vmatprep.mubr.msk.bf16.mxu1 %vm359_vm3, %v1003_v40 }
 0x178   : > { %919 = vmatmul.mubr.msk.bf16.vlgmr.msra.gmra.mrb[4].mxu0 %vm359_vm3, %v1002_v42  ;;  %v741_v53 = vpop.permute.xlu0 %740 }
 0x17c   : > { %v736_v49 = vpop.permute.xlu1 %735 }
 0x180   : > { %937 = vmatmul.mubr.msk.bf16.vlgmr.msra.gmra.mrb[0].mxu1 %vm359_vm3, %v1004_v43  ;;  %v746_v60 = vpop.permute.xlu1 %745 }
 0x24b   : > { %v920_v44 = vpop.f32.mrb[4].mxu0 }
 0x24c   : > { %v472_v45 = vpop.f32.mrb[5].mxu0 }
 0x24d   : > { %v921_v46 = vpop.f32.mrb[6].mxu0 }
 0x24e   : > { %v475_v47 = vpop.f32.mrb[7].mxu0 }
 0x253   : > { %v938_v50 = vpop.f32.mrb[0].mxu1 }
 0x254   : > { %v940_v51 = vadd.f32 %v938_v50, %v920_v44  ;;  %v705_v52 = vpop.f32.mrb[1].mxu1 }
 0x255   : > { %v941_v54 = vadd.f32 %v705_v52, %v472_v45  ;;  %v939_v55 = vpop.f32.mrb[2].mxu1 }
 0x256   : > { %v750_v56 = vadd.f32 %v940_v51, %v741_v53  ;;  %v942_v57 = vadd.f32 %v939_v55, %v921_v46  ;;  %v708_v58 = vpop.f32.mrb[3].mxu1 }
 0x257   : > { %v748_v59 = vadd.f32 %v941_v54, %v731_v48  ;;  %v943_v61 = vadd.f32 %v708_v58, %v475_v47 }
 0x258   : > { %755 = vst.msk [vmem:[%s252_s25 + $0x10] sm:$0xff] %vm752_vm8, %v750_v56  ;;  %v751_v62 = vadd.f32 %v942_v57, %v746_v60 }
 0x259   : > { %753 = vst.msk [vmem:[%s252_s25] sm:$0xff] %vm752_vm8, %v748_v59  ;;  %v749_v63 = vadd.f32 %v943_v61, %v736_v49 }
 0x25a   : > { %756 = vst.msk [vmem:[%s252_s25 + $0x18] sm:$0xff] %vm752_vm8, %v751_v62 }
 0x25b   : > { %754 = vst.msk [vmem:[%s252_s25 + $0x8] sm:$0xff] %vm752_vm8, %v749_v63 }
 0x25c PF: > { %s15_s20 = sadd.s32 1, %s1027_s20   ;;  %s1180_s18 = smov %s1023_s19 }
 0x25d   : > { %p12_p5 = scmp.ge.s32.totalorder %s15_s20, 4   ;;  %s1181_s19 = smov %s1183_s21 }
 0x25f   :  { %14 = sbr.rel (!%p12_p5) target bundleno = 2 (0x2), region = 74 }

</bundles_post_ra>
